<compile_context>
chip_gen: v7x
topology: tpu7x:2x2x1
jax: 0.10.0
libtpu: 0.0.40
codegen_flags: <defaults>
</compile_context>

<pallas_src>
import jax
import jax.numpy as jnp
from jax import lax
from jax.experimental import pallas as pl
from jax.experimental.pallas import tpu as pltpu


def mlp_kernel(xt_ref, w1_ref, b1_ref, w2_ref, b2_ref, w3_ref, b3_ref, o_ref):
    # fc1 + relu: (hn1, d) @ (d, tile_b) -> (hn1, tile_b), f32 MXU accumulation.
    h1 = jnp.dot(w1_ref[...], xt_ref[...], preferred_element_type=jnp.float32)
    h1 = jnp.maximum(h1 + b1_ref[...], 0.0)

    # fc2 + relu: (hn2, hn1) @ (hn1, tile_b) -> (hn2, tile_b).
    h2 = jnp.dot(w2_ref[...], h1, preferred_element_type=jnp.float32)
    h2 = jnp.maximum(h2 + b2_ref[...], 0.0)

    # dropout: identity at inference (model.eval()).
    # TODO(synk): training-mode dropout would use pltpu.prng_seed +
    #             pltpu.prng_random_bits to draw a Bernoulli mask in-kernel.

    # fc3: (1, hn2) @ (hn2, tile_b) -> (1, tile_b), already lane-dense.
    y = jnp.dot(w3_ref[...], h2, preferred_element_type=jnp.float32)
    o_ref[...] = y + b3_ref[...]


def _default_tile_b(batch):
    """Prefer a single full-batch tile (single-TC chips gain nothing from extra
    grid steps; each costs ~0.35 us).  Only split very large batches, using
    multiple-of-128 tiles (lane-dense output stores) and preferring an EVEN
    tile count so v7x's two TensorCores get equal work."""
    if batch % 128 != 0 or batch <= 2048:
        return batch
    fallback = batch
    for cand in (2048, 1024, 512, 256, 128):
        if batch % cand == 0:
            n = batch // cand
            if n >= 2 and n % 2 == 0:
                return cand
            if fallback == batch:
                fallback = cand
    return fallback


def _vmem_cap_bytes():
    """Generation-aware VMEM ceiling: ~3/4 of physical per-core VMEM
    (v7x: 64 MiB/TC -> ~48 MiB; v5e/v6e: 128 MiB -> ~96 MiB)."""
    try:
        capacity = int(pltpu.get_tpu_info().vmem_capacity_bytes)
    except Exception:
        capacity = 64 * 2**20          # conservative default (v7x per-TC)
    return (capacity * 3) // 4


def _vmem_limit_bytes(tile_b, d, hn1, hn2):
    f32 = 4
    streamed = 2 * (d * tile_b + tile_b) * f32                     # x^T in / y out, double-buffered
    weights = 2 * (hn1 * d + hn1 + hn2 * hn1 + hn2 + hn2 + 1) * f32
    activations = 2 * (hn1 + hn2) * tile_b * f32                   # h1 / h2 live values
    est = streamed + weights + activations
    cap = _vmem_cap_bytes()
    # Never request less than the estimate itself; generous headroom otherwise.
    return int(min(max(4 * est, est, 16 * 2**20), cap))


def _cost_estimate(batch, d, hn1, hn2):
    f32 = 4
    flops = 2 * batch * (d * hn1 + hn1 * hn2 + hn2)
    bytes_accessed = f32 * (batch * d + batch
                            + hn1 * d + hn1 + hn2 * hn1 + hn2 + hn2 + 1)
    return pl.CostEstimate(flops=flops, transcendentals=0,
                           bytes_accessed=bytes_accessed)


def mlp_forward(x, params, *, tile_b=None):
    """3-layer MLP (relu, relu, linear-to-1) forward as one Pallas TPU kernel.

    Returns flat (batch,) logits (lane-dense); add [:, None] for PyTorch's
    (batch, 1) shape if needed.
    """
    w1, b1, w2, b2, w3, b3 = params                  # PyTorch (out, in) layouts
    batch, d = x.shape
    hn1 = w1.shape[0]
    hn2 = w2.shape[0]

    if tile_b is None:
        tile_b = _default_tile_b(batch)
    if batch % tile_b != 0:
        raise ValueError(f"batch ({batch}) must be divisible by tile_b ({tile_b})")
    if tile_b != batch and tile_b % 128 != 0:
        raise ValueError("tile_b must be a multiple of 128 (lane-dense output) "
                         "or equal to batch")
    num_tiles = batch // tile_b

    x_t = x.T                                        # (d, batch): batch on lanes

    def weight_spec(shape, single_buffer):
        # Constant block index -> second pipeline buffer buys nothing.
        if single_buffer:
            return pl.BlockSpec(shape, lambda i: (0, 0),
                                pipeline_mode=pl.Buffered(1))
        return pl.BlockSpec(shape, lambda i: (0, 0))

    def run(single_buffer_weights):
        wspec = lambda shape: weight_spec(shape, single_buffer_weights)
        return pl.pallas_call(
            mlp_kernel,
            out_shape=jax.ShapeDtypeStruct((1, batch), jnp.float32),
            grid=(num_tiles,),
            in_specs=[
                pl.BlockSpec((d, tile_b), lambda i: (0, i)),  # x^T, batch-tiled on lanes
                wspec((hn1, d)),                              # W1 (PyTorch layout)
                wspec((hn1, 1)),                              # b1 (column)
                wspec((hn2, hn1)),                            # W2
                wspec((hn2, 1)),                              # b2
                wspec((1, hn2)),                              # W3
                wspec((1, 1)),                                # b3
            ],
            # Lane-dense output: each grid step writes one (1, tile_b) row.
            out_specs=pl.BlockSpec((1, tile_b), lambda i: (0, i)),
            compiler_params=pltpu.CompilerParams(
                dimension_semantics=("parallel",),
                vmem_limit_bytes=_vmem_limit_bytes(tile_b, d, hn1, hn2),
            ),
            cost_estimate=_cost_estimate(batch, d, hn1, hn2),
        )(x_t, w1, b1, w2, b2, w3, b3)

    try:
        out2d = run(True)
    except Exception:
        # Some JAX versions reject pipeline_mode on the main pallas_call
        # pipeline; fall back to default double buffering (weights are tiny).
        out2d = run(False)

    return out2d.reshape(batch)


def init_params(key, input_dim, hn1, hn2):
    """Deterministic synthetic params in PyTorch nn.Linear layout:
    W:(out,in) uniform(+-1/sqrt(fan_in)), b stored as an (out,1) column."""
    ks = jax.random.split(key, 6)

    def linear(kw, kb, fan_in, fan_out):
        bound = 1.0 / jnp.sqrt(fan_in)
        w = jax.random.uniform(kw, (fan_out, fan_in), jnp.float32, -bound, bound)
        b = jax.random.uniform(kb, (fan_out, 1), jnp.float32, -bound, bound)
        return w, b

    w1, b1 = linear(ks[0], ks[1], input_dim, hn1)
    w2, b2 = linear(ks[2], ks[3], hn1, hn2)
    w3, b3 = linear(ks[4], ks[5], hn2, 1)
    return (w1, b1, w2, b2, w3, b3)


def reference(x, params):
    """Pure-JAX f32 reference matching the PyTorch module (eval mode)."""
    w1, b1, w2, b2, w3, b3 = params
    hi = lax.Precision.HIGHEST
    h1 = jnp.maximum(jnp.dot(x, w1.T, precision=hi) + b1[:, 0], 0.0)
    h2 = jnp.maximum(jnp.dot(h1, w2.T, precision=hi) + b2[:, 0], 0.0)
    y = jnp.dot(h2, w3.T, precision=hi) + b3[0, 0]
    return y[:, 0]                                   # flat (batch,) logits


if __name__ == "__main__":
    # Small shapes consistent with the module: batch=8, input_dim=32,
    # hn1=64, hn2=32, output=1 (dropout rate irrelevant at inference).
    B, input_dim, hn1, hn2 = 8, 32, 64, 32

    key = jax.random.PRNGKey(0)
    kx, kp, kx2 = jax.random.split(key, 3)
    x = jax.random.normal(kx, (B, input_dim), dtype=jnp.float32)
    params = init_params(kp, input_dim, hn1, hn2)

    out = jax.block_until_ready(mlp_forward(x, params))
    assert out.shape == (B,)
    ref = reference(x, params)
    assert jnp.allclose(out, ref, atol=2e-3, rtol=2e-3)

    # Larger batch exercising the multi-tile path (lane-dense 128-wide tiles,
    # even tile count for v7x megacore).
    B2 = 512
    x2 = jax.random.normal(kx2, (B2, input_dim), dtype=jnp.float32)
    out2 = jax.block_until_ready(mlp_forward(x2, params, tile_b=128))
    assert out2.shape == (B2,)
    ref2 = reference(x2, params)
    assert jnp.allclose(out2, ref2, atol=2e-3, rtol=2e-3)

    print("KERNEL_OK")
</pallas_src>

<mosaic_0001>
module attributes {stable_mosaic.version = 11 : i64} {
  func.func @mlp_kernel(%arg0: i32, %arg1: memref<32x8xf32, #tpu.memory_space<vmem>>, %arg2: memref<64x32xf32, #tpu.memory_space<vmem>>, %arg3: memref<64x1xf32, #tpu.memory_space<vmem>>, %arg4: memref<32x64xf32, #tpu.memory_space<vmem>>, %arg5: memref<32x1xf32, #tpu.memory_space<vmem>>, %arg6: memref<1x32xf32, #tpu.memory_space<vmem>>, %arg7: memref<1x1xf32, #tpu.memory_space<vmem>>, %arg8: memref<1x8xf32, #tpu.memory_space<vmem>>) attributes {dimension_semantics = [#tpu.dimension_semantics<parallel>], iteration_bounds = array<i64: 1>, scalar_prefetch = 0 : i64, scratch_operands = 0 : i64, tpu.core_type = #tpu.core_type<tc>, window_params = [{transform_indices = @transform_0, window_bounds = array<i64: 32, 8>}, {pipeline_mode = #tpu.pipeline_mode<synchronous>, transform_indices = @transform_1, window_bounds = array<i64: 64, 32>}, {pipeline_mode = #tpu.pipeline_mode<synchronous>, transform_indices = @transform_2, window_bounds = array<i64: 64, 1>}, {pipeline_mode = #tpu.pipeline_mode<synchronous>, transform_indices = @transform_3, window_bounds = array<i64: 32, 64>}, {pipeline_mode = #tpu.pipeline_mode<synchronous>, transform_indices = @transform_4, window_bounds = array<i64: 32, 1>}, {pipeline_mode = #tpu.pipeline_mode<synchronous>, transform_indices = @transform_5, window_bounds = array<i64: 1, 32>}, {pipeline_mode = #tpu.pipeline_mode<synchronous>, transform_indices = @transform_6, window_bounds = array<i64: 1, 1>}, {transform_indices = @transform_7, window_bounds = array<i64: 1, 8>}]} {
    %c0 = arith.constant 0 : index
    %c0_0 = arith.constant 0 : index
    %0 = vector.load %arg2[%c0, %c0_0] : memref<64x32xf32, #tpu.memory_space<vmem>>, vector<64x32xf32>
    %c0_1 = arith.constant 0 : index
    %c0_2 = arith.constant 0 : index
    %1 = vector.load %arg1[%c0_1, %c0_2] : memref<32x8xf32, #tpu.memory_space<vmem>>, vector<32x8xf32>
    %cst = arith.constant dense<0.000000e+00> : vector<64x8xf32>
    %2 = tpu.matmul %0, %1, %cst {dimension_numbers = #tpu.dot_dimension_numbers<[1], [0], [0], [1], [0, 0, 1, 1], [], []>} : vector<64x32xf32>, vector<32x8xf32>, vector<64x8xf32> -> vector<64x8xf32>
    %c0_3 = arith.constant 0 : index
    %c0_4 = arith.constant 0 : index
    %3 = vector.load %arg3[%c0_3, %c0_4] : memref<64x1xf32, #tpu.memory_space<vmem>>, vector<64x1xf32>
    %4 = vector.broadcast %3 : vector<64x1xf32> to vector<64x8xf32>
    %5 = arith.addf %2, %4 : vector<64x8xf32>
    %cst_5 = arith.constant 0.000000e+00 : f32
    %6 = vector.broadcast %cst_5 : f32 to vector<64x8xf32>
    %7 = arith.maximumf %5, %6 : vector<64x8xf32>
    %c0_6 = arith.constant 0 : index
    %c0_7 = arith.constant 0 : index
    %8 = vector.load %arg4[%c0_6, %c0_7] : memref<32x64xf32, #tpu.memory_space<vmem>>, vector<32x64xf32>
    %cst_8 = arith.constant dense<0.000000e+00> : vector<32x8xf32>
    %9 = tpu.matmul %8, %7, %cst_8 {dimension_numbers = #tpu.dot_dimension_numbers<[1], [0], [0], [1], [0, 0, 1, 1], [], []>} : vector<32x64xf32>, vector<64x8xf32>, vector<32x8xf32> -> vector<32x8xf32>
    %c0_9 = arith.constant 0 : index
    %c0_10 = arith.constant 0 : index
    %10 = vector.load %arg5[%c0_9, %c0_10] : memref<32x1xf32, #tpu.memory_space<vmem>>, vector<32x1xf32>
    %11 = vector.broadcast %10 : vector<32x1xf32> to vector<32x8xf32>
    %12 = arith.addf %9, %11 : vector<32x8xf32>
    %cst_11 = arith.constant 0.000000e+00 : f32
    %13 = vector.broadcast %cst_11 : f32 to vector<32x8xf32>
    %14 = arith.maximumf %12, %13 : vector<32x8xf32>
    %c0_12 = arith.constant 0 : index
    %c0_13 = arith.constant 0 : index
    %15 = vector.load %arg6[%c0_12, %c0_13] : memref<1x32xf32, #tpu.memory_space<vmem>>, vector<1x32xf32>
    %cst_14 = arith.constant dense<0.000000e+00> : vector<1x8xf32>
    %16 = tpu.matmul %15, %14, %cst_14 {dimension_numbers = #tpu.dot_dimension_numbers<[1], [0], [0], [1], [0, 0, 1, 1], [], []>} : vector<1x32xf32>, vector<32x8xf32>, vector<1x8xf32> -> vector<1x8xf32>
    %c0_15 = arith.constant 0 : index
    %c0_16 = arith.constant 0 : index
    %17 = vector.load %arg7[%c0_15, %c0_16] : memref<1x1xf32, #tpu.memory_space<vmem>>, vector<1x1xf32>
    %18 = vector.broadcast %17 : vector<1x1xf32> to vector<1x8xf32>
    %19 = arith.addf %16, %18 : vector<1x8xf32>
    %c0_17 = arith.constant 0 : index
    %c0_18 = arith.constant 0 : index
    %20 = vector.load %arg8[%c0_17, %c0_18] : memref<1x8xf32, #tpu.memory_space<vmem>>, vector<1x8xf32>
    tpu.vector_store %arg8[%c0_17, %c0_18], %19 {strides = array<i32>} : memref<1x8xf32, #tpu.memory_space<vmem>>, vector<1x8xf32>,
    return
  }
  func.func @transform_0(%arg0: i32) -> (i32, i32) {
    %c0_i32 = arith.constant 0 : i32
    %c0_i32_0 = arith.constant 0 : i32
    return %c0_i32, %arg0 : i32, i32
  }
  func.func @transform_1(%arg0: i32) -> (i32, i32) {
    %c0_i32 = arith.constant 0 : i32
    %c0_i32_0 = arith.constant 0 : i32
    %c0_i32_1 = arith.constant 0 : i32
    return %c0_i32, %c0_i32_0 : i32, i32
  }
  func.func @transform_2(%arg0: i32) -> (i32, i32) {
    %c0_i32 = arith.constant 0 : i32
    %c0_i32_0 = arith.constant 0 : i32
    %c0_i32_1 = arith.constant 0 : i32
    return %c0_i32, %c0_i32_0 : i32, i32
  }
  func.func @transform_3(%arg0: i32) -> (i32, i32) {
    %c0_i32 = arith.constant 0 : i32
    %c0_i32_0 = arith.constant 0 : i32
    %c0_i32_1 = arith.constant 0 : i32
    return %c0_i32, %c0_i32_0 : i32, i32
  }
  func.func @transform_4(%arg0: i32) -> (i32, i32) {
    %c0_i32 = arith.constant 0 : i32
    %c0_i32_0 = arith.constant 0 : i32
    %c0_i32_1 = arith.constant 0 : i32
    return %c0_i32, %c0_i32_0 : i32, i32
  }
  func.func @transform_5(%arg0: i32) -> (i32, i32) {
    %c0_i32 = arith.constant 0 : i32
    %c0_i32_0 = arith.constant 0 : i32
    %c0_i32_1 = arith.constant 0 : i32
    return %c0_i32, %c0_i32_0 : i32, i32
  }
  func.func @transform_6(%arg0: i32) -> (i32, i32) {
    %c0_i32 = arith.constant 0 : i32
    %c0_i32_0 = arith.constant 0 : i32
    %c0_i32_1 = arith.constant 0 : i32
    return %c0_i32, %c0_i32_0 : i32, i32
  }
  func.func @transform_7(%arg0: i32) -> (i32, i32) {
    %c0_i32 = arith.constant 0 : i32
    %c0_i32_0 = arith.constant 0 : i32
    return %c0_i32, %arg0 : i32, i32
  }
}

module attributes {stable_mosaic.version = 11 : i64} {
  func.func @mlp_kernel(%arg0: i32, %arg1: memref<32x8xf32, #tpu.memory_space<vmem>>, %arg2: memref<64x32xf32, #tpu.memory_space<vmem>>, %arg3: memref<64x1xf32, #tpu.memory_space<vmem>>, %arg4: memref<32x64xf32, #tpu.memory_space<vmem>>, %arg5: memref<32x1xf32, #tpu.memory_space<vmem>>, %arg6: memref<1x32xf32, #tpu.memory_space<vmem>>, %arg7: memref<1x1xf32, #tpu.memory_space<vmem>>, %arg8: memref<1x8xf32, #tpu.memory_space<vmem>>) attributes {dimension_semantics = [#tpu.dimension_semantics<parallel>], iteration_bounds = array<i64: 1>, scalar_prefetch = 0 : i64, scratch_operands = 0 : i64, tpu.core_type = #tpu.core_type<tc>, window_params = [{transform_indices = @transform_0, window_bounds = array<i64: 32, 8>}, {pipeline_mode = #tpu.pipeline_mode<synchronous>, transform_indices = @transform_1, window_bounds = array<i64: 64, 32>}, {pipeline_mode = #tpu.pipeline_mode<synchronous>, transform_indices = @transform_2, window_bounds = array<i64: 64, 1>}, {pipeline_mode = #tpu.pipeline_mode<synchronous>, transform_indices = @transform_3, window_bounds = array<i64: 32, 64>}, {pipeline_mode = #tpu.pipeline_mode<synchronous>, transform_indices = @transform_4, window_bounds = array<i64: 32, 1>}, {pipeline_mode = #tpu.pipeline_mode<synchronous>, transform_indices = @transform_5, window_bounds = array<i64: 1, 32>}, {pipeline_mode = #tpu.pipeline_mode<synchronous>, transform_indices = @transform_6, window_bounds = array<i64: 1, 1>}, {transform_indices = @transform_7, window_bounds = array<i64: 1, 8>}]} {
    %c0 = arith.constant 0 : index
    %c0_0 = arith.constant 0 : index
    %0 = vector.load %arg2[%c0, %c0_0] : memref<64x32xf32, #tpu.memory_space<vmem>>, vector<64x32xf32>
    %c0_1 = arith.constant 0 : index
    %c0_2 = arith.constant 0 : index
    %1 = vector.load %arg1[%c0_1, %c0_2] : memref<32x8xf32, #tpu.memory_space<vmem>>, vector<32x8xf32>
    %cst = arith.constant dense<0.000000e+00> : vector<64x8xf32>
    %2 = tpu.matmul %0, %1, %cst {dimension_numbers = #tpu.dot_dimension_numbers<[1], [0], [0], [1], [0, 0, 1, 1], [], []>} : vector<64x32xf32>, vector<32x8xf32>, vector<64x8xf32> -> vector<64x8xf32>
    %c0_3 = arith.constant 0 : index
    %c0_4 = arith.constant 0 : index
    %3 = vector.load %arg3[%c0_3, %c0_4] : memref<64x1xf32, #tpu.memory_space<vmem>>, vector<64x1xf32>
    %4 = vector.broadcast %3 : vector<64x1xf32> to vector<64x8xf32>
    %5 = arith.addf %2, %4 : vector<64x8xf32>
    %cst_5 = arith.constant 0.000000e+00 : f32
    %6 = vector.broadcast %cst_5 : f32 to vector<64x8xf32>
    %7 = arith.maximumf %5, %6 : vector<64x8xf32>
    %c0_6 = arith.constant 0 : index
    %c0_7 = arith.constant 0 : index
    %8 = vector.load %arg4[%c0_6, %c0_7] : memref<32x64xf32, #tpu.memory_space<vmem>>, vector<32x64xf32>
    %cst_8 = arith.constant dense<0.000000e+00> : vector<32x8xf32>
    %9 = tpu.matmul %8, %7, %cst_8 {dimension_numbers = #tpu.dot_dimension_numbers<[1], [0], [0], [1], [0, 0, 1, 1], [], []>} : vector<32x64xf32>, vector<64x8xf32>, vector<32x8xf32> -> vector<32x8xf32>
    %c0_9 = arith.constant 0 : index
    %c0_10 = arith.constant 0 : index
    %10 = vector.load %arg5[%c0_9, %c0_10] : memref<32x1xf32, #tpu.memory_space<vmem>>, vector<32x1xf32>
    %11 = vector.broadcast %10 : vector<32x1xf32> to vector<32x8xf32>
    %12 = arith.addf %9, %11 : vector<32x8xf32>
    %cst_11 = arith.constant 0.000000e+00 : f32
    %13 = vector.broadcast %cst_11 : f32 to vector<32x8xf32>
    %14 = arith.maximumf %12, %13 : vector<32x8xf32>
    %c0_12 = arith.constant 0 : index
    %c0_13 = arith.constant 0 : index
    %15 = vector.load %arg6[%c0_12, %c0_13] : memref<1x32xf32, #tpu.memory_space<vmem>>, vector<1x32xf32>
    %cst_14 = arith.constant dense<0.000000e+00> : vector<1x8xf32>
    %16 = tpu.matmul %15, %14, %cst_14 {dimension_numbers = #tpu.dot_dimension_numbers<[1], [0], [0], [1], [0, 0, 1, 1], [], []>} : vector<1x32xf32>, vector<32x8xf32>, vector<1x8xf32> -> vector<1x8xf32>
    %c0_15 = arith.constant 0 : index
    %c0_16 = arith.constant 0 : index
    %17 = vector.load %arg7[%c0_15, %c0_16] : memref<1x1xf32, #tpu.memory_space<vmem>>, vector<1x1xf32>
    %18 = vector.broadcast %17 : vector<1x1xf32> to vector<1x8xf32>
    %19 = arith.addf %16, %18 : vector<1x8xf32>
    %c0_17 = arith.constant 0 : index
    %c0_18 = arith.constant 0 : index
    %20 = vector.load %arg8[%c0_17, %c0_18] : memref<1x8xf32, #tpu.memory_space<vmem>>, vector<1x8xf32>
    tpu.vector_store %arg8[%c0_17, %c0_18], %19 {strides = array<i32>} : memref<1x8xf32, #tpu.memory_space<vmem>>, vector<1x8xf32>,
    return
  }
  func.func @transform_0(%arg0: i32) -> (i32, i32) {
    %c0_i32 = arith.constant 0 : i32
    %c0_i32_0 = arith.constant 0 : i32
    return %c0_i32, %arg0 : i32, i32
  }
  func.func @transform_1(%arg0: i32) -> (i32, i32) {
    %c0_i32 = arith.constant 0 : i32
    %c0_i32_0 = arith.constant 0 : i32
    %c0_i32_1 = arith.constant 0 : i32
    return %c0_i32, %c0_i32_0 : i32, i32
  }
  func.func @transform_2(%arg0: i32) -> (i32, i32) {
    %c0_i32 = arith.constant 0 : i32
    %c0_i32_0 = arith.constant 0 : i32
    %c0_i32_1 = arith.constant 0 : i32
    return %c0_i32, %c0_i32_0 : i32, i32
  }
  func.func @transform_3(%arg0: i32) -> (i32, i32) {
    %c0_i32 = arith.constant 0 : i32
    %c0_i32_0 = arith.constant 0 : i32
    %c0_i32_1 = arith.constant 0 : i32
    return %c0_i32, %c0_i32_0 : i32, i32
  }
  func.func @transform_4(%arg0: i32) -> (i32, i32) {
    %c0_i32 = arith.constant 0 : i32
    %c0_i32_0 = arith.constant 0 : i32
    %c0_i32_1 = arith.constant 0 : i32
    return %c0_i32, %c0_i32_0 : i32, i32
  }
  func.func @transform_5(%arg0: i32) -> (i32, i32) {
    %c0_i32 = arith.constant 0 : i32
    %c0_i32_0 = arith.constant 0 : i32
    %c0_i32_1 = arith.constant 0 : i32
    return %c0_i32, %c0_i32_0 : i32, i32
  }
  func.func @transform_6(%arg0: i32) -> (i32, i32) {
    %c0_i32 = arith.constant 0 : i32
    %c0_i32_0 = arith.constant 0 : i32
    %c0_i32_1 = arith.constant 0 : i32
    return %c0_i32, %c0_i32_0 : i32, i32
  }
  func.func @transform_7(%arg0: i32) -> (i32, i32) {
    %c0_i32 = arith.constant 0 : i32
    %c0_i32_0 = arith.constant 0 : i32
    return %c0_i32, %arg0 : i32, i32
  }
}

</mosaic_0001>

<bundles_post_ra>
// kernel: tpu_custom_call.1
= control target key start
LH: loop header
LB: loop body
LE: loop exit
PB: predicated region body
PF: predicated region fallthrough
CT: control target
= control target key end

     0   :  { %s773_s0 = inlined_call_operand.vmem [shape: f32[32,8], index: 0, kind: input, shape index: {}]   ;;  %s774_s1 = inlined_call_operand.vmem [shape: f32[64,32], index: 1, kind: input, shape index: {}]   ;;  %s775_s2 = inlined_call_operand.vmem [shape: f32[64,1], index: 2, kind: input, shape index: {}]   ;;  %s776_s3 = inlined_call_operand.vmem [shape: f32[32,64], index: 3, kind: input, shape index: {}]   ;;  %s777_s4 = inlined_call_operand.vmem [shape: f32[32,1], index: 4, kind: input, shape index: {}]   ;;  %s778_s5 = inlined_call_operand.vmem [shape: f32[1,32], index: 5, kind: input, shape index: {}]   ;;  %s779_s6 = inlined_call_operand.<no memory space> [shape: f32[1,1], index: 6, kind: input, shape index: {}]   ;;  %s780_s7 = inlined_call_operand.hbm [shape: f32[1,8], index: 7, kind: output, shape index: {}]  }
   0x1   :  { %v12_v0 = vstv %s779_s6 }
   0x2   :  { %13 = vst [vmem:[#allocation2] sm:$0x1] %v12_v0 }
   0x3   :  { %v37_v1 = vld [vmem:[%s773_s0] sm:$0xff]  ;;  %v38_v2 = vld [vmem:[%s773_s0 + $0x8] sm:$0xff]  ;;  %v39_v3 = vld [vmem:[%s773_s0 + $0x10] sm:$0xff]  ;;  %vm89_vm0 = vcmask 261120   ;;  %v613_v7 = vmov 0  }
   0x4   :  { %v552_v4 = vpack.c.bf16 %v38_v2, %v37_v1  ;;  %v40_v5 = vld [vmem:[%s773_s0 + $0x18] sm:$0xff]  ;;  %v29_v6 = vld [vmem:[%s774_s1] sm:$0xff]  ;;  %587 = vset.pattern.permute.xlu0 %v613_v7  ;;  %588 = vset.pattern.permute.xlu1 %v613_v7  ;;  %v43_v10 = vld [vmem:[%s775_s2 + $0x10] sm:$0xff] }
   0x5   :  { %v556_v8 = vpack.c.bf16 %v40_v5, %v39_v3  ;;  %507 = vmatprep.mubr.msk.f32.mxu0 %vm89_vm0, %v29_v6  ;;  %v41_v9 = vld [vmem:[%s775_s2] sm:$0xff]  ;;  %v42_v11 = vld [vmem:[%s775_s2 + $0x8] sm:$0xff]  ;;  %61 = vperm.xlu1 %588, %v43_v10   ;;  %v44_v12 = vld [vmem:[%s775_s2 + $0x18] sm:$0xff] }
   0x6   :  { %553 = vmatprep.subr.bf16.mxu0 %v552_v4  ;;  %51 = vperm.xlu0 %587, %v41_v9   ;;  %v30_v13 = vld [vmem:[%s774_s1 + $0x8] sm:$0xff] }
   0x7   :  { %555 = vmatpush3.bf16.msra.mxu0 %v552_v4 }
   0x8   :  { %557 = vmatprep.subr.bf16.mxu0 %v556_v8 }
   0xb   :  { %559 = vmatpush3.bf16.msra.mxu0 %v556_v8 }
   0xc   :  { %14 = vsyncpa [#allocation4], 0  ;;  %v31_v14 = vld [vmem:[%s774_s1 + $0x10] sm:$0xff]  ;;  %56 = vperm.xlu0 %587, %v42_v11   ;;  %v45_v15 = vld [vmem:[%s775_s2 + $0x20] sm:$0xff]  ;;  %66 = vperm.xlu1 %588, %v44_v12   ;;  %vm255_vm1 = vcmask 523264   ;;  %v614_v5 = vmov 0.0|0.0  }
   0xd   :  { %v46_v16 = vld [vmem:[%s775_s2 + $0x28] sm:$0xff]  ;;  %v32_v17 = vld [vmem:[%s774_s1 + $0x18] sm:$0xff]  ;;  %v33_v18 = vld [vmem:[%s774_s1 + $0x20] sm:$0xff]  ;;  %576 = vmatprep.subr.bf16.mxu0 %v614_v5  ;;  %vm615_vm2 = vmmov 0   ;;  %v616_v6 = vmov 0.0   ;;  %s617_s30 = smov [#allocation3]  }
   0xe   :  { %508 = vmatmul.mubr.msk.f32.vlgmr.msra.gmra.mrb[0].mxu0 %vm89_vm0, %v30_v13  ;;  %v47_v19 = vld [vmem:[%s775_s2 + $0x30] sm:$0xff]  ;;  %v48_v20 = vld [vmem:[%s775_s2 + $0x38] sm:$0xff]  ;;  %v34_v21 = vld [vmem:[%s774_s1 + $0x28] sm:$0xff]  ;;  %s449_s8 = sshll.u32 %s617_s30, 4  ;;  %vm441_vm3 = vcmask 57344   ;;  %s450_s8 = int_to_ptr.vmem [resolvable:$true] %s449_s8 }
   0xf   :  { %510 = vmatprep.mubr.msk.f32.mxu0 %vm89_vm0, %v31_v14  ;;  %v35_v22 = vld [vmem:[%s774_s1 + $0x30] sm:$0xff]  ;;  %v231_v23 = vld [vmem:[%s777_s4] sm:$0xff]  ;;  %v232_v24 = vld [vmem:[%s777_s4 + $0x8] sm:$0xff]  ;;  %s589_s9 = scalar_lea.vmem %s450_s8, 16  ;;  %s593_s10 = scalar_lea.vmem %s450_s8, 32 }
  0x10   :  { %71 = vperm.xlu0 %587, %v45_v15   ;;  %76 = vperm.xlu1 %588, %v46_v16   ;;  %v36_v25 = vld [vmem:[%s774_s1 + $0x38] sm:$0xff]  ;;  %v233_v26 = vld [vmem:[%s777_s4 + $0x10] sm:$0xff]  ;;  %v358_v28 = vld [vmem:[#allocation2] sm:$0x1]  ;;  %p590_p0 = scmp.ne.s32.totalorder %s450_s8, %s589_s9  ;;  %p594_p1 = scmp.lt.s32.totalorder %s450_s8, %s450_s8 }
  0x11   :  { %v234_v27 = vld [vmem:[%s777_s4 + $0x18] sm:$0xff]  ;;  %v227_v29 = vld [vmem:[%s776_s3] sm:$0xff]  ;;  %v228_v2 = vld [vmem:[%s776_s3 + $0x8] sm:$0xff]  ;;  %p595_p2 = scmp.lt.s32.totalorder %s593_s10, %s589_s9 }
  0x12   :  { %511 = vmatmul.mubr.msk.f32.gmra.mrb[2].mxu0 %vm89_vm0, %v32_v17  ;;  %535 = vmatprep.mubr.msk.f32.mxu1 %vm255_vm1, %v227_v29  ;;  %v229_v3 = vld [vmem:[%s776_s3 + $0x10] sm:$0xff]  ;;  %v230_v4 = vld [vmem:[%s776_s3 + $0x18] sm:$0xff] }
  0x13   :  { %513 = vmatprep.mubr.msk.f32.mxu0 %vm89_vm0, %v33_v18  ;;  %p596_p3 = por %p595_p2, %p594_p1 }
  0x14   :  { %81 = vperm.xlu0 %587, %v47_v19   ;;  %86 = vperm.xlu1 %588, %v48_v20  }
  0x15   :  { %p597_p4 = pnand %p596_p3, %p590_p0 }
  0x16   :  { %514 = vmatmul.mubr.msk.f32.gmra.mrb[4].mxu0 %vm89_vm0, %v34_v21 }
  0x17   :  { %516 = vmatprep.mubr.msk.f32.mxu0 %vm89_vm0, %v35_v22 }
  0x18   :  { %237 = vperm.xlu0 %587, %v231_v23   ;;  %242 = vperm.xlu1 %588, %v232_v24  }
  0x1a   :  { %517 = vmatmul.mubr.msk.f32.gmra.mrb[6].mxu0 %vm89_vm0, %v36_v25  ;;  %v357_v25 = vld [vmem:[%s778_s5] sm:$0x1] }
  0x1b   :  { %549 = vmatprep.mubr.msk.f32.mxu0 %vm615_vm2, %v616_v6 }
  0x1c   :  { %247 = vperm.xlu0 %587, %v233_v26   ;;  %252 = vperm.xlu1 %588, %v234_v27   ;;  %v364_v26 = vlaneseq }
  0x1e   :  { %v365_v27 = vshrl.u32 %v364_v26, 7 }
  0x20   :  { %361 = vperm.xlu0 %587, %v358_v28   ;;  %v366_v28 = vsub.s32 0, %v365_v27 }
  0x84   :  { %v62_v31 = vpop.permute.xlu1 %61 }
  0x85   :  { %v52_v30 = vpop.permute.xlu0 %51 }
  0x8b   :  { %v57_v32 = vpop.permute.xlu0 %56  ;;  %v67_v33 = vpop.permute.xlu1 %66 }
  0x8f   :  { %v77_v43 = vpop.permute.xlu1 %76  ;;  %v72_v46 = vpop.permute.xlu0 %71 }
  0x93   :  { %v87_v55 = vpop.permute.xlu1 %86  ;;  %v82_v58 = vpop.permute.xlu0 %81 }
  0x97   :  { %v243_v7 = vpop.permute.xlu1 %242  ;;  %v238_v8 = vpop.permute.xlu0 %237 }
  0x9b   :  { %v253_v14 = vpop.permute.xlu1 %252  ;;  %v248_v17 = vpop.permute.xlu0 %247 }
  0x9f   :  { %v362_v29 = vpop.permute.xlu0 %361 }
  0xe1   :  { %v509_v34 = vpop.f32.mrb[0].mxu0 }
  0xe2   :  { %v186_v35 = vadd.f32 %v509_v34, %v57_v32  ;;  %v180_v36 = vpop.f32.mrb[1].mxu0 }
  0xe3   :  { %v181_v37 = vadd.f32 %v180_v36, %v52_v30  ;;  %v367_v30 = vrot.slane %v362_v29, %v366_v28 }
  0xe4   :  { %v220_v38 = vmax.f32 %v186_v35, 0.0 }
  0xe5   :  { %v219_v39 = vmax.f32 %v181_v37, 0.0  ;;  %v512_v40 = vpop.f32.mrb[2].mxu0 }
  0xe6   :  { %v196_v41 = vadd.f32 %v512_v40, %v67_v33  ;;  %v190_v42 = vpop.f32.mrb[3].mxu0 }
  0xe7   :  { %v191_v44 = vadd.f32 %v190_v42, %v62_v31  ;;  %v560_v45 = vpack.c.bf16 %v220_v38, %v219_v39 }
  0xe8   :  { %v222_v47 = vmax.f32 %v196_v41, 0.0 }
  0xe9   :  { %v221_v48 = vmax.f32 %v191_v44, 0.0  ;;  %v515_v49 = vpop.f32.mrb[4].mxu0  ;;  %561 = vmatprep.subr.bf16.mxu1 %v560_v45 }
  0xea   :  { %v206_v50 = vadd.f32 %v515_v49, %v77_v43  ;;  %v200_v51 = vpop.f32.mrb[5].mxu0  ;;  %563 = vmatpush3.bf16.msra.mxu1 %v560_v45 }
  0xeb   :  { %v564_v52 = vpack.c.bf16 %v222_v47, %v221_v48  ;;  %v201_v53 = vadd.f32 %v200_v51, %v72_v46 }
  0xec   :  { %v224_v54 = vmax.f32 %v206_v50, 0.0 }
  0xed   :  { %v223_v56 = vmax.f32 %v201_v53, 0.0  ;;  %v518_v57 = vpop.f32.mrb[6].mxu0  ;;  %565 = vmatprep.subr.bf16.mxu1 %v564_v52 }
  0xee   :  { %v216_v59 = vadd.f32 %v518_v57, %v87_v55  ;;  %v210_v60 = vpop.f32.mrb[7].mxu0  ;;  %567 = vmatpush3.bf16.msra.mxu1 %v564_v52 }
  0xef   :  { %v568_v61 = vpack.c.bf16 %v224_v54, %v223_v56  ;;  %v211_v62 = vadd.f32 %v210_v60, %v82_v58 }
  0xf0   :  { %v226_v63 = vmax.f32 %v216_v59, 0.0 }
  0xf1   :  { %v225_v0 = vmax.f32 %v211_v62, 0.0  ;;  %569 = vmatprep.subr.bf16.mxu1 %v568_v61 }
  0xf2   :  { %571 = vmatpush3.bf16.msra.mxu1 %v568_v61 }
  0xf3   :  { %v572_v1 = vpack.c.bf16 %v226_v63, %v225_v0 }
  0xf5   :  { %573 = vmatprep.subr.bf16.mxu1 %v572_v1 }
  0xf6   :  { %575 = vmatpush3.bf16.msra.mxu1 %v572_v1 }
  0xf9   :  { %536 = vmatmul.mubr.msk.f32.vlgmr.msra.gmra.mrb[0].mxu1 %vm255_vm1, %v228_v2 }
  0xfa   :  { %538 = vmatprep.mubr.msk.f32.mxu1 %vm255_vm1, %v229_v3 }
  0xfd   :  { %539 = vmatmul.mubr.msk.f32.gmra.mrb[2].mxu1 %vm255_vm1, %v230_v4 }
 0x1cc   :  { %v537_v9 = vpop.f32.mrb[0].mxu1 }
 0x1cd   :  { %v340_v10 = vadd.f32 %v537_v9, %v243_v7  ;;  %v334_v11 = vpop.f32.mrb[1].mxu1 }
 0x1ce   :  { %v335_v12 = vadd.f32 %v334_v11, %v238_v8 }
 0x1cf   :  { %v354_v13 = vmax.f32 %v340_v10, 0.0 }
 0x1d0   :  { %v353_v15 = vmax.f32 %v335_v12, 0.0  ;;  %v540_v16 = vpop.f32.mrb[2].mxu1 }
 0x1d1   :  { %v350_v18 = vadd.f32 %v540_v16, %v253_v14  ;;  %v344_v19 = vpop.f32.mrb[3].mxu1 }
 0x1d2   :  { %v577_v20 = vpack.c.bf16 %v354_v13, %v353_v15  ;;  %v345_v21 = vadd.f32 %v344_v19, %v248_v17 }
 0x1d3   :  { %v356_v22 = vmax.f32 %v350_v18, 0.0 }
 0x1d4   :  { %v355_v23 = vmax.f32 %v345_v21, 0.0  ;;  %578 = vmatpush3.bf16.msra.mxu0 %v577_v20 }
 0x1d5   :  { %579 = vmatprep.subr.bf16.mxu0 %v614_v5 }
 0x1d6   :  { %v580_v24 = vpack.c.bf16 %v356_v22, %v355_v23 }
 0x1d8   :  { %581 = vmatpush3.bf16.msra.mxu0 %v580_v24 }
 0x1db   :  { %550 = vmatmul.mubr.msk.f32.vlgmr.msra.gmra.mrb[8].mxu0 %vm89_vm0, %v357_v25 }
 0x2ae   :  { %v437_v31 = vpop.f32.mrb[8].mxu0 }
 0x2af   :  { %v438_v32 = vadd.f32 %v437_v31, %v367_v30  ;;  %v551_v33 = vpop.f32.mrb[9].mxu0 }
 0x2b1   :  { %442 = vst.msk [vmem:[#allocation3] sm:$0x1] %vm441_vm3, %v438_v32 }
 0x2b2   :  { %600 = shalt.err (!%p597_p4)
}
 0x2b3   :  { %s601_s11 = scalar_lea.hbm %s780_s7, 16 }
 0x2b4   :  { %p602_p5 = scmp.ne.s32.totalorder %s780_s7, %s601_s11  ;;  %p605_p6 = scmp.lt.u32.totalorder %s601_s11, %s780_s7 }
 0x2b6   :  { %p607_p7 = pnand %p605_p6, %p602_p5 }
 0x2b8   :  { %610 = shalt.err (!%p607_p7)
}
 0x2b9   :  { %452 = dma.vmem_to_hbm [thread:$0]  %s450_s8, 16, %s780_s7, [#allocation4]  }
 0x2ba   :  { %611 = dma.done.wait [#allocation4], 16  }
 0x2bb   :  { %612 = vsyncadd [#allocation4], 4294967280 }
 0x2bc   :  { %456 = vsyncpa [#allocation4], 1 }

// kernel: tpu_custom_call.1
= control target key start
LH: loop header
LB: loop body
LE: loop exit
PB: predicated region body
PF: predicated region fallthrough
CT: control target
= control target key end

     0   :  { %s773_s0 = inlined_call_operand.vmem [shape: f32[32,8], index: 0, kind: input, shape index: {}]   ;;  %s774_s1 = inlined_call_operand.vmem [shape: f32[64,32], index: 1, kind: input, shape index: {}]   ;;  %s775_s2 = inlined_call_operand.vmem [shape: f32[64,1], index: 2, kind: input, shape index: {}]   ;;  %s776_s3 = inlined_call_operand.vmem [shape: f32[32,64], index: 3, kind: input, shape index: {}]   ;;  %s777_s4 = inlined_call_operand.vmem [shape: f32[32,1], index: 4, kind: input, shape index: {}]   ;;  %s778_s5 = inlined_call_operand.vmem [shape: f32[1,32], index: 5, kind: input, shape index: {}]   ;;  %s779_s6 = inlined_call_operand.<no memory space> [shape: f32[1,1], index: 6, kind: input, shape index: {}]   ;;  %s780_s7 = inlined_call_operand.hbm [shape: f32[1,8], index: 7, kind: output, shape index: {}]  }
   0x1   :  { %v12_v0 = vstv %s779_s6 }
   0x2   :  { %13 = vst [vmem:[#allocation2] sm:$0x1] %v12_v0 }
   0x3   :  { %v37_v1 = vld [vmem:[%s773_s0] sm:$0xff]  ;;  %v38_v2 = vld [vmem:[%s773_s0 + $0x8] sm:$0xff]  ;;  %v39_v3 = vld [vmem:[%s773_s0 + $0x10] sm:$0xff]  ;;  %vm89_vm0 = vcmask 261120   ;;  %v613_v7 = vmov 0  }
   0x4   :  { %v552_v4 = vpack.c.bf16 %v38_v2, %v37_v1  ;;  %v40_v5 = vld [vmem:[%s773_s0 + $0x18] sm:$0xff]  ;;  %v29_v6 = vld [vmem:[%s774_s1] sm:$0xff]  ;;  %587 = vset.pattern.permute.xlu0 %v613_v7  ;;  %588 = vset.pattern.permute.xlu1 %v613_v7  ;;  %v43_v10 = vld [vmem:[%s775_s2 + $0x10] sm:$0xff] }
   0x5   :  { %v556_v8 = vpack.c.bf16 %v40_v5, %v39_v3  ;;  %507 = vmatprep.mubr.msk.f32.mxu0 %vm89_vm0, %v29_v6  ;;  %v41_v9 = vld [vmem:[%s775_s2] sm:$0xff]  ;;  %v42_v11 = vld [vmem:[%s775_s2 + $0x8] sm:$0xff]  ;;  %61 = vperm.xlu1 %588, %v43_v10   ;;  %v44_v12 = vld [vmem:[%s775_s2 + $0x18] sm:$0xff] }
   0x6   :  { %553 = vmatprep.subr.bf16.mxu0 %v552_v4  ;;  %51 = vperm.xlu0 %587, %v41_v9   ;;  %v30_v13 = vld [vmem:[%s774_s1 + $0x8] sm:$0xff] }
   0x7   :  { %555 = vmatpush3.bf16.msra.mxu0 %v552_v4 }
   0x8   :  { %557 = vmatprep.subr.bf16.mxu0 %v556_v8 }
   0xb   :  { %559 = vmatpush3.bf16.msra.mxu0 %v556_v8 }
   0xc   :  { %14 = vsyncpa [#allocation4], 0  ;;  %v31_v14 = vld [vmem:[%s774_s1 + $0x10] sm:$0xff]  ;;  %56 = vperm.xlu0 %587, %v42_v11   ;;  %v45_v15 = vld [vmem:[%s775_s2 + $0x20] sm:$0xff]  ;;  %66 = vperm.xlu1 %588, %v44_v12   ;;  %vm255_vm1 = vcmask 523264   ;;  %v614_v5 = vmov 0.0|0.0  }
   0xd   :  { %v46_v16 = vld [vmem:[%s775_s2 + $0x28] sm:$0xff]  ;;  %v32_v17 = vld [vmem:[%s774_s1 + $0x18] sm:$0xff]  ;;  %v33_v18 = vld [vmem:[%s774_s1 + $0x20] sm:$0xff]  ;;  %576 = vmatprep.subr.bf16.mxu0 %v614_v5  ;;  %vm615_vm2 = vmmov 0   ;;  %v616_v6 = vmov 0.0   ;;  %s617_s30 = smov [#allocation3]  }
   0xe   :  { %508 = vmatmul.mubr.msk.f32.vlgmr.msra.gmra.mrb[0].mxu0 %vm89_vm0, %v30_v13  ;;  %v47_v19 = vld [vmem:[%s775_s2 + $0x30] sm:$0xff]  ;;  %v48_v20 = vld [vmem:[%s775_s2 + $0x38] sm:$0xff]  ;;  %v34_v21 = vld [vmem:[%s774_s1 + $0x28] sm:$0xff]  ;;  %s449_s8 = sshll.u32 %s617_s30, 4  ;;  %vm441_vm3 = vcmask 57344   ;;  %s450_s8 = int_to_ptr.vmem [resolvable:$true] %s449_s8 }
   0xf   :  { %510 = vmatprep.mubr.msk.f32.mxu0 %vm89_vm0, %v31_v14  ;;  %v35_v22 = vld [vmem:[%s774_s1 + $0x30] sm:$0xff]  ;;  %v231_v23 = vld [vmem:[%s777_s4] sm:$0xff]  ;;  %v232_v24 = vld [vmem:[%s777_s4 + $0x8] sm:$0xff]  ;;  %s589_s9 = scalar_lea.vmem %s450_s8, 16  ;;  %s593_s10 = scalar_lea.vmem %s450_s8, 32 }
  0x10   :  { %71 = vperm.xlu0 %587, %v45_v15   ;;  %76 = vperm.xlu1 %588, %v46_v16   ;;  %v36_v25 = vld [vmem:[%s774_s1 + $0x38] sm:$0xff]  ;;  %v233_v26 = vld [vmem:[%s777_s4 + $0x10] sm:$0xff]  ;;  %v358_v28 = vld [vmem:[#allocation2] sm:$0x1]  ;;  %p590_p0 = scmp.ne.s32.totalorder %s450_s8, %s589_s9  ;;  %p594_p1 = scmp.lt.s32.totalorder %s450_s8, %s450_s8 }
  0x11   :  { %v234_v27 = vld [vmem:[%s777_s4 + $0x18] sm:$0xff]  ;;  %v227_v29 = vld [vmem:[%s776_s3] sm:$0xff]  ;;  %v228_v2 = vld [vmem:[%s776_s3 + $0x8] sm:$0xff]  ;;  %p595_p2 = scmp.lt.s32.totalorder %s593_s10, %s589_s9 }
  0x12   :  { %511 = vmatmul.mubr.msk.f32.gmra.mrb[2].mxu0 %vm89_vm0, %v32_v17  ;;  %535 = vmatprep.mubr.msk.f32.mxu1 %vm255_vm1, %v227_v29  ;;  %v229_v3 = vld [vmem:[%s776_s3 + $0x10] sm:$0xff]  ;;  %v230_v4 = vld [vmem:[%s776_s3 + $0x18] sm:$0xff] }
  0x13   :  { %513 = vmatprep.mubr.msk.f32.mxu0 %vm89_vm0, %v33_v18  ;;  %p596_p3 = por %p595_p2, %p594_p1 }
  0x14   :  { %81 = vperm.xlu0 %587, %v47_v19   ;;  %86 = vperm.xlu1 %588, %v48_v20  }
  0x15   :  { %p597_p4 = pnand %p596_p3, %p590_p0 }
  0x16   :  { %514 = vmatmul.mubr.msk.f32.gmra.mrb[4].mxu0 %vm89_vm0, %v34_v21 }
  0x17   :  { %516 = vmatprep.mubr.msk.f32.mxu0 %vm89_vm0, %v35_v22 }
  0x18   :  { %237 = vperm.xlu0 %587, %v231_v23   ;;  %242 = vperm.xlu1 %588, %v232_v24  }
  0x1a   :  { %517 = vmatmul.mubr.msk.f32.gmra.mrb[6].mxu0 %vm89_vm0, %v36_v25  ;;  %v357_v25 = vld [vmem:[%s778_s5] sm:$0x1] }
  0x1b   :  { %549 = vmatprep.mubr.msk.f32.mxu0 %vm615_vm2, %v616_v6 }
  0x1c   :  { %247 = vperm.xlu0 %587, %v233_v26   ;;  %252 = vperm.xlu1 %588, %v234_v27   ;;  %v364_v26 = vlaneseq }
  0x1e   :  { %v365_v27 = vshrl.u32 %v364_v26, 7 }
  0x20   :  { %361 = vperm.xlu0 %587, %v358_v28   ;;  %v366_v28 = vsub.s32 0, %v365_v27 }
  0x84   :  { %v62_v31 = vpop.permute.xlu1 %61 }
  0x85   :  { %v52_v30 = vpop.permute.xlu0 %51 }
  0x8b   :  { %v57_v32 = vpop.permute.xlu0 %56  ;;  %v67_v33 = vpop.permute.xlu1 %66 }
  0x8f   :  { %v77_v43 = vpop.permute.xlu1 %76  ;;  %v72_v46 = vpop.permute.xlu0 %71 }
  0x93   :  { %v87_v55 = vpop.permute.xlu1 %86  ;;  %v82_v58 = vpop.permute.xlu0 %81 }
  0x97   :  { %v243_v7 = vpop.permute.xlu1 %242  ;;  %v238_v8 = vpop.permute.xlu0 %237 }
  0x9b   :  { %v253_v14 = vpop.permute.xlu1 %252  ;;  %v248_v17 = vpop.permute.xlu0 %247 }
  0x9f   :  { %v362_v29 = vpop.permute.xlu0 %361 }
  0xe1   :  { %v509_v34 = vpop.f32.mrb[0].mxu0 }
  0xe2   :  { %v186_v35 = vadd.f32 %v509_v34, %v57_v32  ;;  %v180_v36 = vpop.f32.mrb[1].mxu0 }
  0xe3   :  { %v181_v37 = vadd.f32 %v180_v36, %v52_v30  ;;  %v367_v30 = vrot.slane %v362_v29, %v366_v28 }
  0xe4   :  { %v220_v38 = vmax.f32 %v186_v35, 0.0 }
  0xe5   :  { %v219_v39 = vmax.f32 %v181_v37, 0.0  ;;  %v512_v40 = vpop.f32.mrb[2].mxu0 }
  0xe6   :  { %v196_v41 = vadd.f32 %v512_v40, %v67_v33  ;;  %v190_v42 = vpop.f32.mrb[3].mxu0 }
  0xe7   :  { %v191_v44 = vadd.f32 %v190_v42, %v62_v31  ;;  %v560_v45 = vpack.c.bf16 %v220_v38, %v219_v39 }
  0xe8   :  { %v222_v47 = vmax.f32 %v196_v41, 0.0 }
  0xe9   :  { %v221_v48 = vmax.f32 %v191_v44, 0.0  ;;  %v515_v49 = vpop.f32.mrb[4].mxu0  ;;  %561 = vmatprep.subr.bf16.mxu1 %v560_v45 }
  0xea   :  { %v206_v50 = vadd.f32 %v515_v49, %v77_v43  ;;  %v200_v51 = vpop.f32.mrb[5].mxu0  ;;  %563 = vmatpush3.bf16.msra.mxu1 %v560_v45 }
  0xeb   :  { %v564_v52 = vpack.c.bf16 %v222_v47, %v221_v48  ;;  %v201_v53 = vadd.f32 %v200_v51, %v72_v46 }
  0xec   :  { %v224_v54 = vmax.f32 %v206_v50, 0.0 }
  0xed   :  { %v223_v56 = vmax.f32 %v201_v53, 0.0  ;;  %v518_v57 = vpop.f32.mrb[6].mxu0  ;;  %565 = vmatprep.subr.bf16.mxu1 %v564_v52 }
  0xee   :  { %v216_v59 = vadd.f32 %v518_v57, %v87_v55  ;;  %v210_v60 = vpop.f32.mrb[7].mxu0  ;;  %567 = vmatpush3.bf16.msra.mxu1 %v564_v52 }
  0xef   :  { %v568_v61 = vpack.c.bf16 %v224_v54, %v223_v56  ;;  %v211_v62 = vadd.f32 %v210_v60, %v82_v58 }
  0xf0   :  { %v226_v63 = vmax.f32 %v216_v59, 0.0 }
  0xf1   :  { %v225_v0 = vmax.f32 %v211_v62, 0.0  ;;  %569 = vmatprep.subr.bf16.mxu1 %v568_v61 }
  0xf2   :  { %571 = vmatpush3.bf16.msra.mxu1 %v568_v61 }
  0xf3   :  { %v572_v1 = vpack.c.bf16 %v226_v63, %v225_v0 }
  0xf5   :  { %573 = vmatprep.subr.bf16.mxu1 %v572_v1 }
  0xf6   :  { %575 = vmatpush3.bf16.msra.mxu1 %v572_v1 }
  0xf9   :  { %536 = vmatmul.mubr.msk.f32.vlgmr.msra.gmra.mrb[0].mxu1 %vm255_vm1, %v228_v2 }
  0xfa   :  { %538 = vmatprep.mubr.msk.f32.mxu1 %vm255_vm1, %v229_v3 }
  0xfd   :  { %539 = vmatmul.mubr.msk.f32.gmra.mrb[2].mxu1 %vm255_vm1, %v230_v4 }
 0x1cc   :  { %v537_v9 = vpop.f32.mrb[0].mxu1 }
 0x1cd   :  { %v340_v10 = vadd.f32 %v537_v9, %v243_v7  ;;  %v334_v11 = vpop.f32.mrb[1].mxu1 }
 0x1ce   :  { %v335_v12 = vadd.f32 %v334_v11, %v238_v8 }
 0x1cf   :  { %v354_v13 = vmax.f32 %v340_v10, 0.0 }
 0x1d0   :  { %v353_v15 = vmax.f32 %v335_v12, 0.0  ;;  %v540_v16 = vpop.f32.mrb[2].mxu1 }
 0x1d1   :  { %v350_v18 = vadd.f32 %v540_v16, %v253_v14  ;;  %v344_v19 = vpop.f32.mrb[3].mxu1 }
 0x1d2   :  { %v577_v20 = vpack.c.bf16 %v354_v13, %v353_v15  ;;  %v345_v21 = vadd.f32 %v344_v19, %v248_v17 }
 0x1d3   :  { %v356_v22 = vmax.f32 %v350_v18, 0.0 }
 0x1d4   :  { %v355_v23 = vmax.f32 %v345_v21, 0.0  ;;  %578 = vmatpush3.bf16.msra.mxu0 %v577_v20 }
 0x1d5   :  { %579 = vmatprep.subr.bf16.mxu0 %v614_v5 }
 0x1d6   :  { %v580_v24 = vpack.c.bf16 %v356_v22, %v355_v23 }
 0x1d8   :  { %581 = vmatpush3.bf16.msra.mxu0 %v580_v24 }
 0x1db   :  { %550 = vmatmul.mubr.msk.f32.vlgmr.msra.gmra.mrb[8].mxu0 %vm89_vm0, %v357_v25 }
 0x2ae   :  { %v437_v31 = vpop.f32.mrb[8].mxu0 }
 0x2af   :  { %v438_v32 = vadd.f32 %v437_v31, %v367_v30  ;;  %v551_v33 = vpop.f32.mrb[9].mxu0 }
 0x2b1   :  { %442 = vst.msk [vmem:[#allocation3] sm:$0x1] %vm441_vm3, %v438_v32 }
 0x2b2   :  { %600 = shalt.err (!%p597_p4)
}
 0x2b3   :  { %s601_s11 = scalar_lea.hbm %s780_s7, 16 }
 0x2b4   :  { %p602_p5 = scmp.ne.s32.totalorder %s780_s7, %s601_s11  ;;  %p605_p6 = scmp.lt.u32.totalorder %s601_s11, %s780_s7 }
 0x2b6   :  { %p607_p7 = pnand %p605_p6, %p602_p5 }
 0x2b8   :  { %610 = shalt.err (!%p607_p7)
}
 0x2b9   :  { %452 = dma.vmem_to_hbm [thread:$0]  %s450_s8, 16, %s780_s7, [#allocation4]  }
 0x2ba   :  { %611 = dma.done.wait [#allocation4], 16  }
 0x2bb   :  { %612 = vsyncadd [#allocation4], 4294967280 }
 0x2bc   :  { %456 = vsyncpa [#allocation4], 1 }

</bundles_post_ra>
